<compile_context>
chip_gen: v7x
topology: tpu7x:2x2x1
jax: 0.10.0
libtpu: 0.0.40
codegen_flags: <defaults>
</compile_context>

<pallas_src>
import functools

import jax
import jax.numpy as jnp
from jax import lax
from jax.experimental import pallas as pl
from jax.experimental.pallas import tpu as pltpu

LANES = 128
SUBLANES = 8
MAX_TILE_ROWS = 4096                 # (4096,128) f32 = 2 MiB per block
VMEM_LIMIT_BYTES = 32 * 1024 * 1024  # explicit, safe on v5e/v6e/v7x

ALPHA = 0.25
GAMMA = 2.0
BETA = 0.8

_X_KERNEL_DTYPES = (jnp.float32, jnp.bfloat16, jnp.float16)
_T_KERNEL_DTYPES = (jnp.float32, jnp.bfloat16, jnp.float16,
                    jnp.int8, jnp.uint8, jnp.int32, jnp.uint32)
# Sublane tiling requirement of the second-minor dim, keyed by dtype itemsize.
_SUBLANE_ALIGN = {1: 32, 2: 16, 4: 8}


def _round_up(x, m):
    return (x + m - 1) // m * m


def _tensorcores_per_chip():
    """2 for dual-TC / megacore chips (v7x, v4, v5p); 1 for v5e / v6e."""
    try:
        kind = jax.devices()[0].device_kind.lower()
    except Exception:
        return 1
    if "lite" in kind or "v5e" in kind or "v6" in kind:
        return 1
    if "v7" in kind or "7x" in kind or "v4" in kind or "v5p" in kind:
        return 2
    return 1


def _hybrid_bce_sum_kernel(x_ref, t_ref, o_ref, acc_ref, *,
                           tile_rows, steps, num_blocks, rows_valid,
                           needs_mask, binary_targets):
    """Accumulate per-element BCE into an (8,128) vreg accumulator.

    Grid = (shard, step): shard is megacore-parallel, step is the reduction
    axis. Each shard writes its (8,128) partial sum on its last step.
    """
    s = pl.program_id(0)   # parallel shard
    i = pl.program_id(1)   # reduction step within the shard

    @pl.when(i == 0)
    def _():
        acc_ref[...] = jnp.zeros_like(acc_ref)

    p = x_ref[...].astype(jnp.float32)

    if binary_targets:
        t_raw = t_ref[...]
        if jnp.issubdtype(t_raw.dtype, jnp.floating):
            pos = t_raw.astype(jnp.float32) > 0.5
        else:
            pos = t_raw != 0
        # One transcendental per element (EUP) instead of two; exact for 0/1
        # labels, including torch's clamp of the log terms at -100.
        bce_elem = -jnp.maximum(jnp.log(jnp.where(pos, p, 1.0 - p)), -100.0)
    else:
        # Matches torch binary_cross_entropy (log terms clamped at -100).
        t = t_ref[...].astype(jnp.float32)
        log_p = jnp.maximum(jnp.log(p), -100.0)
        log_1mp = jnp.maximum(jnp.log(1.0 - p), -100.0)
        bce_elem = -(t * log_p + (1.0 - t) * log_1mp)

    def accumulate(vals):
        # Pure VPU accumulation: fold tile_rows/8 vregs into one (8,128) vreg.
        acc_ref[...] += vals.reshape(
            tile_rows // SUBLANES, SUBLANES, LANES).sum(axis=0)

    if needs_mask:
        logical_block = s * steps + i
        # Only the last real block (partial tail) and phantom blocks (clamped
        # re-reads on an odd block count) need masking; all other blocks take
        # the cheap unmasked path.
        is_edge = logical_block >= num_blocks - 1

        @pl.when(jnp.logical_not(is_edge))
        def _():
            accumulate(bce_elem)

        @pl.when(is_edge)
        def _():
            # Rows at/after rows_valid hold garbage VMEM (partial boundary or
            # phantom block); log(garbage) can be NaN/Inf, but jnp.where is a
            # select: unselected lanes are dropped, never propagated. Keep the
            # compute-then-select ordering.
            base_row = logical_block * tile_rows
            row_ids = base_row + lax.broadcasted_iota(
                jnp.int32, (tile_rows, LANES), 0)
            accumulate(jnp.where(row_ids < rows_valid, bce_elem, 0.0))
    else:
        accumulate(bce_elem)

    @pl.when(i == steps - 1)
    def _():
        o_ref[0] = acc_ref[...]


def hybrid_loss(inputs, targets, smooth=1, *, assume_binary_targets=False):
    """JAX/Pallas equivalent of HybridLoss.forward (smooth unused, as in torch)."""
    del smooth

    x = jnp.ravel(inputs)
    if x.dtype not in _X_KERNEL_DTYPES:
        x = x.astype(jnp.float32)

    t = jnp.ravel(targets)
    t_is_discrete = bool(t.dtype == jnp.bool_
                         or jnp.issubdtype(t.dtype, jnp.integer))
    # 1-log path is exact for 0/1 labels; float targets stay on the safe
    # soft-label path unless the caller opts in.
    binary_targets = bool(assume_binary_targets or t_is_discrete)
    if t.dtype == jnp.bool_:
        t = t.astype(jnp.uint8)
    elif t.dtype not in _T_KERNEL_DTYPES:
        t = t.astype(jnp.int8 if t_is_discrete else jnp.float32)

    n_valid = x.shape[0]

    # ---- Row / tile planning ------------------------------------------------
    rows_raw = -(-n_valid // LANES)
    t_align = max(SUBLANES, _SUBLANE_ALIGN.get(t.dtype.itemsize, SUBLANES))
    if rows_raw > MAX_TILE_ROWS:
        rows = rows_raw
        tile_rows = MAX_TILE_ROWS          # multiple of 32: legal for every dtype
    else:
        if rows_raw % t_align == 0:
            rows = rows_raw                # aligned single block
        elif n_valid % LANES == 0 and rows_raw % SUBLANES == 0:
            rows = rows_raw                # block == full array dim: always legal
        else:
            rows = _round_up(rows_raw, t_align)
        tile_rows = rows

    # Host pad to the planned row count. Pad values p = t = 1 contribute
    # exactly zero BCE on both paths, so no element-level mask is needed.
    # TODO(synk): when n_valid % 128 != 0 this concatenate still materializes a
    # full copy of x and t; avoiding it needs 1-D / native-shape block support.
    pad = rows * LANES - n_valid
    if pad:
        x = jnp.concatenate([x, jnp.ones((pad,), x.dtype)])
        t = jnp.concatenate([t, jnp.ones((pad,), t.dtype)])
    x2 = x.reshape(rows, LANES)    # contiguous reshape -> bitcast, no copy
    t2 = t.reshape(rows, LANES)

    # ---- Grid planning --------------------------------------------------------
    num_blocks = -(-rows // tile_rows)
    num_shards = _tensorcores_per_chip() if num_blocks >= 2 else 1
    steps = -(-num_blocks // num_shards)
    has_phantom = num_shards * steps > num_blocks
    needs_mask = num_shards * steps * tile_rows > rows

    if has_phantom:
        def in_index(sh, st):
            # Clamp phantom blocks onto the last real block; their rows are
            # zeroed by the in-kernel row mask.
            return (jnp.minimum(sh * steps + st, num_blocks - 1), 0)
    else:
        def in_index(sh, st):
            return (sh * steps + st, 0)

    kernel = functools.partial(
        _hybrid_bce_sum_kernel,
        tile_rows=tile_rows,
        steps=steps,
        num_blocks=num_blocks,
        rows_valid=rows,
        needs_mask=needs_mask,
        binary_targets=binary_targets,
    )

    partials = pl.pallas_call(
        kernel,
        out_shape=jax.ShapeDtypeStruct((num_shards, SUBLANES, LANES),
                                       jnp.float32),
        grid_spec=pltpu.PrefetchScalarGridSpec(
            num_scalar_prefetch=0,
            grid=(num_shards, steps),
            in_specs=[
                pl.BlockSpec((tile_rows, LANES), in_index),
                pl.BlockSpec((tile_rows, LANES), in_index),
            ],
            out_specs=pl.BlockSpec((1, SUBLANES, LANES),
                                   lambda sh, st: (sh, 0, 0)),
            scratch_shapes=[pltpu.VMEM((SUBLANES, LANES), jnp.float32)],
        ),
        # TODO(synk): verify in the Mosaic dump that the shard axis maps to
        # both v7x TensorCores; if not, switch axis 0 to pltpu.CORE_PARALLEL.
        compiler_params=pltpu.CompilerParams(
            dimension_semantics=("parallel", "arbitrary"),
            vmem_limit_bytes=VMEM_LIMIT_BYTES),
    )(x2, t2)

    # Tiny scalar epilogue (runs once): mean, focal transform, blend.
    bce = jnp.sum(partials) * (1.0 / n_valid)          # reduction='mean'
    one_minus = 1.0 - jnp.exp(-bce)
    focal = ALPHA * (one_minus * one_minus) * bce      # gamma == 2 -> exact square
    return BETA * bce + focal


def _reference(inputs, targets):
    p = jnp.ravel(inputs).astype(jnp.float32)
    t = jnp.ravel(targets).astype(jnp.float32)
    log_p = jnp.maximum(jnp.log(p), -100.0)
    log_1mp = jnp.maximum(jnp.log(1.0 - p), -100.0)
    bce = jnp.mean(-(t * log_p + (1.0 - t) * log_1mp))
    focal = ALPHA * (1.0 - jnp.exp(-bce)) ** GAMMA * bce
    return BETA * bce + focal


if __name__ == "__main__":
    key = jax.random.PRNGKey(0)
    k1, k2, k3, k4 = jax.random.split(key, 4)

    # Small segmentation-like case: probabilities in (0,1), float binary mask
    # (safe 2-log soft-label path).
    shape_small = (2, 4, 16, 16)
    x_s = jax.random.uniform(k1, shape_small, jnp.float32,
                             minval=1e-4, maxval=1.0 - 1e-4)
    t_s = (jax.random.uniform(k2, shape_small, jnp.float32) > 0.5).astype(
        jnp.float32)

    loss_s = jax.block_until_ready(hybrid_loss(x_s, t_s))
    ref_s = _reference(x_s, t_s)
    assert jnp.allclose(loss_s, ref_s, rtol=1e-5, atol=1e-6), (loss_s, ref_s)

    # Opt-in 1-log fast path for float 0/1 masks must agree.
    loss_sb = jax.block_until_ready(
        hybrid_loss(x_s, t_s, assume_binary_targets=True))
    assert jnp.allclose(loss_sb, ref_s, rtol=1e-5, atol=1e-6), (loss_sb, ref_s)

    # Integer (uint8) mask: auto 1-log path + native 1-byte targets in-kernel.
    t_u8 = (jax.random.uniform(k2, shape_small, jnp.float32) > 0.5).astype(
        jnp.uint8)
    loss_u8 = jax.block_until_ready(hybrid_loss(x_s, t_u8))
    ref_u8 = _reference(x_s, t_u8.astype(jnp.float32))
    assert jnp.allclose(loss_u8, ref_u8, rtol=1e-5, atol=1e-6), (loss_u8, ref_u8)

    # Larger non-128-multiple case: multi-block reduction, lane padding, and
    # pl.when-gated tail-row masking (float-target soft path).
    shape_big = (3, 8, 161, 161)
    x_b = jax.random.uniform(k3, shape_big, jnp.float32,
                             minval=1e-4, maxval=1.0 - 1e-4)
    t_b_f = (jax.random.uniform(k4, shape_big, jnp.float32) > 0.5).astype(
        jnp.float32)
    loss_b = jax.block_until_ready(hybrid_loss(x_b, t_b_f))
    ref_b = _reference(x_b, t_b_f)
    assert jnp.allclose(loss_b, ref_b, rtol=1e-4, atol=1e-6), (loss_b, ref_b)

    # Same large case with a uint8 mask: multi-block + 1-byte targets +
    # auto-enabled 1-log path + tail mask.
    t_b_u8 = t_b_f.astype(jnp.uint8)
    loss_b_u8 = jax.block_until_ready(hybrid_loss(x_b, t_b_u8))
    assert jnp.allclose(loss_b_u8, ref_b, rtol=1e-4, atol=1e-6), (loss_b_u8, ref_b)

    print("KERNEL_OK")
</pallas_src>

<mosaic_0001>
module attributes {stable_mosaic.version = 11 : i64} {
  func.func @_hybrid_bce_sum_kernel(%arg0: i32, %arg1: i32, %arg2: memref<16x128xf32, #tpu.memory_space<vmem>>, %arg3: memref<16x128xf32, #tpu.memory_space<vmem>>, %arg4: memref<1x8x128xf32, #tpu.memory_space<vmem>>, %arg5: memref<8x128xf32, #tpu.memory_space<vmem>>) attributes {dimension_semantics = [#tpu.dimension_semantics<parallel>, #tpu.dimension_semantics<arbitrary>], iteration_bounds = array<i64: 1, 1>, scalar_prefetch = 0 : i64, scratch_operands = 1 : i64, tpu.core_type = #tpu.core_type<tc>, window_params = [{transform_indices = @transform_0, window_bounds = array<i64: 16, 128>}, {transform_indices = @transform_1, window_bounds = array<i64: 16, 128>}, {transform_indices = @transform_2, window_bounds = array<i64: 1, 8, 128>}]} {
    %c0_i32 = arith.constant 0 : i32
    %0 = arith.cmpi eq, %arg1, %c0_i32 : i32
    %1 = arith.extui %0 : i1 to i32
    %c0_i32_0 = arith.constant 0 : i32
    %2 = arith.cmpi ne, %1, %c0_i32_0 : i32
    scf.if %2 {
      %cst_15 = arith.constant 0.000000e+00 : f32
      %28 = vector.broadcast %cst_15 : f32 to vector<8x128xf32>
      %c0_16 = arith.constant 0 : index
      %c0_17 = arith.constant 0 : index
      %29 = vector.load %arg5[%c0_16, %c0_17] : memref<8x128xf32, #tpu.memory_space<vmem>>, vector<8x128xf32>
      tpu.vector_store %arg5[%c0_16, %c0_17], %28 {strides = array<i32>} : memref<8x128xf32, #tpu.memory_space<vmem>>, vector<8x128xf32>,
    } else {
    }
    %c0 = arith.constant 0 : index
    %c0_1 = arith.constant 0 : index
    %3 = vector.load %arg2[%c0, %c0_1] : memref<16x128xf32, #tpu.memory_space<vmem>>, vector<16x128xf32>
    %c0_2 = arith.constant 0 : index
    %c0_3 = arith.constant 0 : index
    %4 = vector.load %arg3[%c0_2, %c0_3] : memref<16x128xf32, #tpu.memory_space<vmem>>, vector<16x128xf32>
    %5 = math.log %3 : vector<16x128xf32>
    %cst = arith.constant -1.000000e+02 : f32
    %6 = vector.broadcast %cst : f32 to vector<16x128xf32>
    %7 = arith.maximumf %5, %6 : vector<16x128xf32>
    %cst_4 = arith.constant 1.000000e+00 : f32
    %8 = vector.broadcast %cst_4 : f32 to vector<16x128xf32>
    %9 = arith.subf %8, %3 : vector<16x128xf32>
    %10 = math.log %9 : vector<16x128xf32>
    %cst_5 = arith.constant -1.000000e+02 : f32
    %11 = vector.broadcast %cst_5 : f32 to vector<16x128xf32>
    %12 = arith.maximumf %10, %11 : vector<16x128xf32>
    %13 = arith.mulf %4, %7 : vector<16x128xf32>
    %cst_6 = arith.constant 1.000000e+00 : f32
    %14 = vector.broadcast %cst_6 : f32 to vector<16x128xf32>
    %15 = arith.subf %14, %4 : vector<16x128xf32>
    %16 = arith.mulf %15, %12 : vector<16x128xf32>
    %17 = arith.addf %13, %16 : vector<16x128xf32>
    %cst_7 = arith.constant 0.000000e+00 : f32
    %18 = vector.broadcast %cst_7 : f32 to vector<16x128xf32>
    %19 = arith.subf %18, %17 : vector<16x128xf32>
    %c0_8 = arith.constant 0 : index
    %c0_9 = arith.constant 0 : index
    %20 = vector.load %arg5[%c0_8, %c0_9] : memref<8x128xf32, #tpu.memory_space<vmem>>, vector<8x128xf32>
    %21 = vector.shape_cast %19 : vector<16x128xf32> to vector<2x8x128xf32>
    %cst_10 = arith.constant dense<0.000000e+00> : vector<8x128xf32>
    %22 = vector.multi_reduction <add>, %21, %cst_10 [0] : vector<2x8x128xf32> to vector<8x128xf32>
    %23 = arith.addf %20, %22 : vector<8x128xf32>
    %c0_11 = arith.constant 0 : index
    %c0_12 = arith.constant 0 : index
    %24 = vector.load %arg5[%c0_11, %c0_12] : memref<8x128xf32, #tpu.memory_space<vmem>>, vector<8x128xf32>
    tpu.vector_store %arg5[%c0_11, %c0_12], %23 {strides = array<i32>} : memref<8x128xf32, #tpu.memory_space<vmem>>, vector<8x128xf32>,
    %c0_i32_13 = arith.constant 0 : i32
    %25 = arith.cmpi eq, %arg1, %c0_i32_13 : i32
    %26 = arith.extui %25 : i1 to i32
    %c0_i32_14 = arith.constant 0 : i32
    %27 = arith.cmpi ne, %26, %c0_i32_14 : i32
    scf.if %27 {
      %c0_15 = arith.constant 0 : index
      %c0_16 = arith.constant 0 : index
      %28 = vector.load %arg5[%c0_15, %c0_16] : memref<8x128xf32, #tpu.memory_space<vmem>>, vector<8x128xf32>
      %c0_17 = arith.constant 0 : index
      %c0_18 = arith.constant 0 : index
      %c0_19 = arith.constant 0 : index
      %29 = vector.load %arg4[%c0_17, %c0_18, %c0_19] : memref<1x8x128xf32, #tpu.memory_space<vmem>>, vector<1x8x128xf32>
      %30 = vector.shape_cast %29 : vector<1x8x128xf32> to vector<8x128xf32>
      %31 = vector.shape_cast %28 : vector<8x128xf32> to vector<1x8x128xf32>
      tpu.vector_store %arg4[%c0_17, %c0_18, %c0_19], %31 {strides = array<i32>} : memref<1x8x128xf32, #tpu.memory_space<vmem>>, vector<1x8x128xf32>,
    } else {
    }
    return
  }
  func.func @transform_0(%arg0: i32, %arg1: i32) -> (i32, i32) {
    %c1_i32 = arith.constant 1 : i32
    %0 = arith.muli %arg0, %c1_i32 : i32
    %1 = arith.addi %0, %arg1 : i32
    %c0_i32 = arith.constant 0 : i32
    %c0_i32_0 = arith.constant 0 : i32
    return %1, %c0_i32 : i32, i32
  }
  func.func @transform_1(%arg0: i32, %arg1: i32) -> (i32, i32) {
    %c1_i32 = arith.constant 1 : i32
    %0 = arith.muli %arg0, %c1_i32 : i32
    %1 = arith.addi %0, %arg1 : i32
    %c0_i32 = arith.constant 0 : i32
    %c0_i32_0 = arith.constant 0 : i32
    return %1, %c0_i32 : i32, i32
  }
  func.func @transform_2(%arg0: i32, %arg1: i32) -> (i32, i32, i32) {
    %c0_i32 = arith.constant 0 : i32
    %c0_i32_0 = arith.constant 0 : i32
    %c0_i32_1 = arith.constant 0 : i32
    return %arg0, %c0_i32, %c0_i32_0 : i32, i32, i32
  }
}

</mosaic_0001>

<bundles_post_ra>
// kernel: tpu_custom_call.1
= control target key start
LH: loop header
LB: loop body
LE: loop exit
PB: predicated region body
PF: predicated region fallthrough
CT: control target
= control target key end

     0   :  { %7 = vsyncpa [#allocation4], 0  ;;  %s251_s0 = inlined_call_operand.hbm [shape: f32[16,128], index: 0, kind: input, shape index: {}]   ;;  %s252_s1 = inlined_call_operand.hbm [shape: f32[16,128], index: 1, kind: input, shape index: {}]   ;;  %s253_s2 = inlined_call_operand.hbm [shape: f32[1,8,128], index: 2, kind: output, shape index: {}]  }
   0x1   :  { %8 = vsyncpa [#allocation7], 0 }
   0x2   :  { %9 = vsyncpa [#allocation5], 0  ;;  %s195_s9 = smov [#allocation3]   ;;  %s123_s13 = scalar_lea.hbm %s251_s0, 256 }
   0x3   :  { %s19_s10 = sshll.u32 %s195_s9, 4  ;;  %p124_p0 = scmp.ne.s32.totalorder %s251_s0, %s123_s13  ;;  %s20_s10 = int_to_ptr.vmem [resolvable:$true] %s19_s10 }
   0x4   :  { %p127_p1 = scmp.lt.u32.totalorder %s123_s13, %s251_s0 }
   0x6   :  { %p129_p2 = pnand %p127_p1, %p124_p0 }
   0x8   :  { %132 = shalt.err (!%p129_p2)
}
   0x9   :  { %s133_s18 = scalar_lea.vmem %s20_s10, 256  ;;  %p138_p4 = scmp.lt.s32.totalorder %s20_s10, %s20_s10 }
   0xa   :  { %p134_p3 = scmp.ne.s32.totalorder %s20_s10, %s133_s18  ;;  %p139_p5 = scmp.lt.s32.totalorder %s133_s18, %s133_s18 }
   0xc   :  { %p140_p6 = por %p139_p5, %p138_p4 }
   0xe   :  { %p141_p7 = pnand %p140_p6, %p134_p3 }
  0x10   :  { %144 = shalt.err (!%p141_p7)
}
  0x11   :  { %s196_s19 = smov 128   ;;  %s197_s20 = smov 8  }
  0x12   :  { %25 = dma.hbm_to_vmem [thread:$0]  %s251_s0, 256, %s20_s10, [#allocation4], %s196_s19, %s196_s19, %s197_s20  }
  0x13   :  { %s198_s23 = smov [#allocation6]   ;;  %s145_s27 = scalar_lea.hbm %s252_s1, 256 }
  0x14   :  { %s35_s24 = sshll.u32 %s198_s23, 4  ;;  %p146_p8 = scmp.ne.s32.totalorder %s252_s1, %s145_s27  ;;  %s36_s24 = int_to_ptr.vmem [resolvable:$true] %s35_s24 }
  0x15   :  { %p149_p9 = scmp.lt.u32.totalorder %s145_s27, %s252_s1 }
  0x17   :  { %p151_p10 = pnand %p149_p9, %p146_p8 }
  0x19   :  { %154 = shalt.err (!%p151_p10)
}
  0x1a   :  { %s155_s4 = scalar_lea.vmem %s36_s24, 256  ;;  %p160_p12 = scmp.lt.s32.totalorder %s36_s24, %s36_s24 }
  0x1b   :  { %p156_p11 = scmp.ne.s32.totalorder %s36_s24, %s155_s4  ;;  %p161_p13 = scmp.lt.s32.totalorder %s155_s4, %s155_s4 }
  0x1d   :  { %p162_p0 = por %p161_p13, %p160_p12 }
  0x1f   :  { %p163_p1 = pnand %p162_p0, %p156_p11 }
  0x21   :  { %166 = shalt.err (!%p163_p1)
}
  0x22   :  { %41 = dma.hbm_to_vmem [thread:$0]  %s252_s1, 256, %s36_s24, [#allocation7], %s196_s19, %s196_s19, %s197_s20  }
  0x23   :  { %189 = dma.done.wait [#allocation4], 256  }
  0x24   :  { %190 = vsyncadd [#allocation4], 4294967040 }
  0x25   :  { %191 = dma.done.wait [#allocation7], 256  }
  0x26   :  { %192 = vsyncadd [#allocation7], 4294967040  ;;  %v57_v0 = vld [vmem:[#allocation3] sm:$0xff]  ;;  %v58_v1 = vld [vmem:[#allocation3 + $0x8] sm:$0xff]  ;;  %s199_s1 = smov [#allocation8]  }
  0x27   :  { %115 = vlog2.f32 %v57_v0  ;;  %v67_v2 = vsub.f32 1.0, %v57_v0  ;;  %v68_v3 = vsub.f32 1.0, %v58_v1  ;;  %v59_v5 = vld [vmem:[#allocation6] sm:$0xff]  ;;  %v60_v7 = vld [vmem:[#allocation6 + $0x8] sm:$0xff]  ;;  %s100_s6 = sshll.u32 %s199_s1, 4  ;;  %s101_s6 = int_to_ptr.vmem [resolvable:$true] %s100_s6 }
  0x28   :  { %117 = vlog2.f32 %v58_v1  ;;  %v77_v14 = vsub.f32 1.0, %v59_v5  ;;  %v78_v17 = vsub.f32 1.0, %v60_v7  ;;  %s167_s7 = scalar_lea.vmem %s101_s6, 128  ;;  %p172_p3 = scmp.lt.s32.totalorder %s101_s6, %s101_s6 }
  0x29   :  { %119 = vlog2.f32 %v67_v2  ;;  %p168_p2 = scmp.ne.s32.totalorder %s101_s6, %s167_s7  ;;  %p173_p4 = scmp.lt.s32.totalorder %s167_s7, %s167_s7 }
  0x2a   :  { %121 = vlog2.f32 %v68_v3 }
  0x2b   :  { %p174_p5 = por %p173_p4, %p172_p3 }
  0x2d   :  { %p175_p6 = pnand %p174_p5, %p168_p2 }
  0x31   :  { %v116_v4 = vpop.eup %115 }
  0x32   :  { %v118_v6 = vpop.eup %117  ;;  %v62_v8 = vmul.f32 0.6931472, %v116_v4 }
  0x33   :  { %v120_v9 = vpop.eup %119  ;;  %v64_v10 = vmul.f32 0.6931472, %v118_v6 }
  0x34   :  { %v122_v11 = vpop.eup %121  ;;  %v65_v12 = vmax.f32 %v62_v8, -100.0  ;;  %v70_v13 = vmul.f32 0.6931472, %v120_v9 }
  0x35   :  { %v66_v15 = vmax.f32 %v64_v10, -100.0  ;;  %v72_v16 = vmul.f32 0.6931472, %v122_v11 }
  0x36   :  { %v73_v18 = vmax.f32 %v70_v13, -100.0  ;;  %v75_v19 = vmul.f32 %v65_v12, %v59_v5 }
  0x37   :  { %v74_v20 = vmax.f32 %v72_v16, -100.0  ;;  %v76_v21 = vmul.f32 %v66_v15, %v60_v7 }
  0x38   :  { %v79_v22 = vmul.f32 %v77_v14, %v73_v18 }
  0x39   :  { %v80_v23 = vmul.f32 %v78_v17, %v74_v20 }
  0x3a   :  { %v81_v24 = vadd.f32 %v79_v22, %v75_v19 }
  0x3b   :  { %v82_v25 = vadd.f32 %v80_v23, %v76_v21 }
  0x3c   :  { %v83_v26 = vsub.f32 0.0, %v81_v24 }
  0x3d   :  { %v84_v27 = vsub.f32 0.0, %v82_v25 }
  0x3f   :  { %v86_v28 = vadd.f32 %v84_v27, %v83_v26 }
  0x41   :  { %93 = vst [vmem:[#allocation8] sm:$0xff] %v86_v28 }
  0x42   :  { %178 = shalt.err (!%p175_p6)
}
  0x43   :  { %s179_s10 = scalar_lea.hbm %s253_s2, 128 }
  0x44   :  { %p180_p7 = scmp.ne.s32.totalorder %s253_s2, %s179_s10  ;;  %p183_p8 = scmp.lt.u32.totalorder %s179_s10, %s253_s2 }
  0x46   :  { %p185_p9 = pnand %p183_p8, %p180_p7 }
  0x48   :  { %188 = shalt.err (!%p185_p9)
}
  0x49   :  { %103 = dma.vmem_to_hbm [thread:$0]  %s101_s6, 128, %s253_s2, [#allocation5]  }
  0x4a   :  { %193 = dma.done.wait [#allocation5], 128  }
  0x4b   :  { %194 = vsyncadd [#allocation5], 4294967168 }
  0x4c   :  { %107 = vsyncpa [#allocation4], 1 }
  0x4d   :  { %108 = vsyncpa [#allocation7], 1 }
  0x4e   :  { %109 = vsyncpa [#allocation5], 1 }

</bundles_post_ra>
